<compile_context>
chip_gen: v5e
topology: v5e:2x2
jax: 0.10.0
libtpu: 0.0.40
codegen_flags: <defaults>
</compile_context>

<pallas_src>
import functools
import math

import jax
import jax.numpy as jnp
from jax.experimental import pallas as pl
from jax.experimental.pallas import tpu as pltpu

SCALE_MIN = 0.0001
SCALE_MAX = 1.0
SOFTPLUS_THRESHOLD = 20.0  # torch.nn.Softplus default (beta=1, threshold=20)

# Dropping PyTorch's softplus "x > threshold -> x" linear branch is only valid
# because the result is clamped to SCALE_MAX far below the threshold.
assert SCALE_MAX <= SOFTPLUS_THRESHOLD


def _cdiv(a, b):
    return -(-a // b)


def _round_up(x, m):
    return _cdiv(x, m) * m


def _block_diag(w, pack):
    """(K, A) -> (pack*K, pack*A) block-diagonal weight (pack copies of w)."""
    k, a = w.shape
    eye = jnp.eye(pack, dtype=w.dtype)
    return (eye[:, None, :, None] * w[None, :, None, :]).reshape(pack * k, pack * a)


def _gaussian_head_kernel(x_ref, w_ref, b_ref, loc_ref, scale_ref, *, loc_cols):
    # One fused MXU matmul covers both heads for PACK batch rows per lane-row:
    #   y[:, :loc_cols]  -> loc pre-activations, y[:, loc_cols:] -> scale.
    y = jnp.dot(x_ref[...], w_ref[...], preferred_element_type=jnp.float32)
    y = y + b_ref[...]

    # loc_cols is a multiple of 128 by construction, so both halves are clean
    # vreg-aligned lane groups (no cross-lane shuffles) and each transcendental
    # only runs on the lanes that need it.
    y_loc = y[:, :loc_cols]
    y_scale = y[:, loc_cols:]

    loc_ref[...] = jnp.tanh(y_loc).astype(loc_ref.dtype)

    # softplus + clamp.  jnp.minimum keeps exp() finite (also guards any garbage
    # rows in a ragged last block, which are discarded by the masked writeback).
    sp = jnp.log1p(jnp.exp(jnp.minimum(y_scale, SOFTPLUS_THRESHOLD)))
    scale_ref[...] = jnp.clip(sp, SCALE_MIN, SCALE_MAX).astype(scale_ref.dtype)


@functools.partial(jax.jit, static_argnames=("tile_b",))
def gaussian_policy_head(x, w_loc, b_loc, w_scale, b_scale, *, tile_b=4096):
    """Returns (loc, scale) of the Normal distribution.

    x       : (B, input_size)           float32
    w_loc   : (input_size, action_size) (stored as W.T vs torch.nn.Linear)
    b_loc   : (1, action_size)
    w_scale : (input_size, action_size)
    b_scale : (1, action_size)
    """
    B, K = x.shape
    A = w_loc.shape[1]

    # Pack PACK batch rows per 128-lane row so pack*A is a multiple of 128.
    pack = 128 // math.gcd(A, 128)
    kp = pack * K          # packed feature width
    ap = pack * A          # packed action width (multiple of 128)

    # Block-diagonal fused weight (kp, 2*ap): cols [:ap] -> loc, [ap:] -> scale.
    # (In a real model these would be pre-packed once outside the train step.)
    w_p = jnp.concatenate([_block_diag(w_loc, pack), _block_diag(w_scale, pack)], axis=1)
    b_p = jnp.concatenate([jnp.tile(b_loc, (1, pack)), jnp.tile(b_scale, (1, pack))], axis=1)

    # (B, K) -> (B/pack, pack*K) is a free row-major view; pad (one extra pass
    # over x) only when B is not a multiple of `pack`.
    b_pad = _round_up(B, pack)
    x_in = jnp.pad(x, ((0, b_pad - B), (0, 0))) if b_pad != B else x
    bp_rows = b_pad // pack
    x_p = x_in.reshape(bp_rows, kp)

    # Tile the packed batch dim.  Keep >=2 grid steps when possible so the
    # "parallel" axis can feed both of v7x's TensorCores.  No padding to the
    # tile size -- Pallas masks the ragged last block.
    if bp_rows <= 8:
        tb = bp_rows
    else:
        tb = max(8, min(max(8, tile_b // pack), _round_up(_cdiv(bp_rows, 2), 8)))
    grid = (_cdiv(bp_rows, tb),)

    cost = pl.CostEstimate(
        flops=2 * b_pad * K * 2 * A,
        transcendentals=3 * b_pad * A,  # tanh + exp + log1p per action element
        bytes_accessed=4 * (x_p.size + w_p.size + b_p.size + 2 * bp_rows * ap),
    )

    # NOTE: pipeline_mode=pl.Buffered(3) on the x spec is a possible extra sweep.
    loc_p, scale_p = pl.pallas_call(
        functools.partial(_gaussian_head_kernel, loc_cols=ap),
        out_shape=(
            jax.ShapeDtypeStruct((bp_rows, ap), jnp.float32),
            jax.ShapeDtypeStruct((bp_rows, ap), jnp.float32),
        ),
        grid_spec=pltpu.PrefetchScalarGridSpec(
            num_scalar_prefetch=0,
            grid=grid,
            in_specs=[
                pl.BlockSpec((tb, kp), lambda i: (i, 0)),       # x tile (streams)
                pl.BlockSpec((kp, 2 * ap), lambda i: (0, 0)),   # fused weight (resident)
                pl.BlockSpec((1, 2 * ap), lambda i: (0, 0)),    # fused bias (resident)
            ],
            out_specs=[
                pl.BlockSpec((tb, ap), lambda i: (i, 0)),       # loc  (lane-dense)
                pl.BlockSpec((tb, ap), lambda i: (i, 0)),       # scale (lane-dense)
            ],
        ),
        compiler_params=pltpu.CompilerParams(
            dimension_semantics=("parallel",),
        ),
        cost_estimate=cost,
    )(x_p, w_p, b_p)

    # (bp_rows, pack*A) -> (B, A) is a free row-major reshape; the [:B] slice is
    # a no-op unless the batch had to be padded to a multiple of `pack`.
    loc = loc_p.reshape(b_pad, A)[:B]
    scale = scale_p.reshape(b_pad, A)[:B]
    return loc, scale


def _init_linear_params(key, in_features, out_features):
    """Deterministic init mimicking torch.nn.Linear default (uniform +/- 1/sqrt(in))."""
    k_w, k_b = jax.random.split(key)
    bound = 1.0 / jnp.sqrt(jnp.float32(in_features))
    # Stored as (in, out) == W.T so the kernel computes x @ W.
    w = jax.random.uniform(k_w, (in_features, out_features), jnp.float32, -bound, bound)
    b = jax.random.uniform(k_b, (1, out_features), jnp.float32, -bound, bound)
    return w, b


def _reference(x, w_loc, b_loc, w_scale, b_scale):
    loc = jnp.tanh(x @ w_loc + b_loc)
    scale = jnp.clip(jax.nn.softplus(x @ w_scale + b_scale), SCALE_MIN, SCALE_MAX)
    return loc, scale


if __name__ == "__main__":
    key = jax.random.PRNGKey(0)
    k_x, k_loc, k_scale = jax.random.split(key, 3)

    batch = 8
    input_size = 32
    action_size = 8

    x = jax.random.normal(k_x, (batch, input_size), jnp.float32)
    w_loc, b_loc = _init_linear_params(k_loc, input_size, action_size)
    w_scale, b_scale = _init_linear_params(k_scale, input_size, action_size)

    loc, scale = gaussian_policy_head(x, w_loc, b_loc, w_scale, b_scale)
    jax.block_until_ready((loc, scale))

    loc_ref, scale_ref = _reference(x, w_loc, b_loc, w_scale, b_scale)
    assert loc.shape == (batch, action_size) and scale.shape == (batch, action_size)
    assert jnp.allclose(loc, loc_ref, atol=1e-5, rtol=1e-5)
    assert jnp.allclose(scale, scale_ref, atol=1e-5, rtol=1e-5)

    # Ragged batch: exercises the pack-padding + multi-step ragged-grid path.
    xb = jax.random.normal(k_x, (1000, input_size), jnp.float32)
    loc_b, scale_b = gaussian_policy_head(xb, w_loc, b_loc, w_scale, b_scale)
    jax.block_until_ready((loc_b, scale_b))
    loc_br, scale_br = _reference(xb, w_loc, b_loc, w_scale, b_scale)
    assert jnp.allclose(loc_b, loc_br, atol=1e-5, rtol=1e-5)
    assert jnp.allclose(scale_b, scale_br, atol=1e-5, rtol=1e-5)

    # Pack-aligned batch: no padding, >=2 grid steps.
    xc = jax.random.normal(k_x, (256, input_size), jnp.float32)
    loc_c, scale_c = gaussian_policy_head(xc, w_loc, b_loc, w_scale, b_scale)
    jax.block_until_ready((loc_c, scale_c))
    loc_cr, scale_cr = _reference(xc, w_loc, b_loc, w_scale, b_scale)
    assert jnp.allclose(loc_c, loc_cr, atol=1e-5, rtol=1e-5)
    assert jnp.allclose(scale_c, scale_cr, atol=1e-5, rtol=1e-5)

    print("KERNEL_OK")
</pallas_src>

<mosaic_0001>
module attributes {stable_mosaic.version = 11 : i64} {
  func.func @_gaussian_head_kernel(%arg0: i32, %arg1: memref<1x512xf32, #tpu.memory_space<vmem>>, %arg2: memref<512x256xf32, #tpu.memory_space<vmem>>, %arg3: memref<1x256xf32, #tpu.memory_space<vmem>>, %arg4: memref<1x128xf32, #tpu.memory_space<vmem>>, %arg5: memref<1x128xf32, #tpu.memory_space<vmem>>) attributes {dimension_semantics = [#tpu.dimension_semantics<parallel>], iteration_bounds = array<i64: 1>, scalar_prefetch = 0 : i64, scratch_operands = 0 : i64, tpu.core_type = #tpu.core_type<tc>, window_params = [{transform_indices = @transform_0, window_bounds = array<i64: 1, 512>}, {pipeline_mode = #tpu.pipeline_mode<synchronous>, transform_indices = @transform_1, window_bounds = array<i64: 512, 256>}, {pipeline_mode = #tpu.pipeline_mode<synchronous>, transform_indices = @transform_2, window_bounds = array<i64: 1, 256>}, {transform_indices = @transform_3, window_bounds = array<i64: 1, 128>}, {transform_indices = @transform_4, window_bounds = array<i64: 1, 128>}]} {
    %c0 = arith.constant 0 : index
    %c0_0 = arith.constant 0 : index
    %0 = vector.load %arg1[%c0, %c0_0] : memref<1x512xf32, #tpu.memory_space<vmem>>, vector<1x512xf32>
    %c0_1 = arith.constant 0 : index
    %c0_2 = arith.constant 0 : index
    %1 = vector.load %arg2[%c0_1, %c0_2] : memref<512x256xf32, #tpu.memory_space<vmem>>, vector<512x256xf32>
    %cst = arith.constant dense<0.000000e+00> : vector<1x256xf32>
    %2 = tpu.matmul %0, %1, %cst {dimension_numbers = #tpu.dot_dimension_numbers<[1], [0], [0], [1], [0, 0, 1, 1], [], []>} : vector<1x512xf32>, vector<512x256xf32>, vector<1x256xf32> -> vector<1x256xf32>
    %c0_3 = arith.constant 0 : index
    %c0_4 = arith.constant 0 : index
    %3 = vector.load %arg3[%c0_3, %c0_4] : memref<1x256xf32, #tpu.memory_space<vmem>>, vector<1x256xf32>
    %4 = arith.addf %2, %3 : vector<1x256xf32>
    %5 = vector.extract_strided_slice %4 {offsets = [0, 0], sizes = [1, 128], strides = [1, 1]} : vector<1x256xf32> to vector<1x128xf32>
    %6 = vector.extract_strided_slice %4 {offsets = [0, 128], sizes = [1, 128], strides = [1, 1]} : vector<1x256xf32> to vector<1x128xf32>
    %7 = math.tanh %5 : vector<1x128xf32>
    %c0_5 = arith.constant 0 : index
    %c0_6 = arith.constant 0 : index
    %8 = vector.load %arg4[%c0_5, %c0_6] : memref<1x128xf32, #tpu.memory_space<vmem>>, vector<1x128xf32>
    tpu.vector_store %arg4[%c0_5, %c0_6], %7 {strides = array<i32>} : memref<1x128xf32, #tpu.memory_space<vmem>>, vector<1x128xf32>,
    %cst_7 = arith.constant 2.000000e+01 : f32
    %9 = vector.broadcast %cst_7 : f32 to vector<1x128xf32>
    %10 = arith.minimumf %6, %9 : vector<1x128xf32>
    %11 = math.exp %10 : vector<1x128xf32>
    %12 = math.log1p %11 : vector<1x128xf32>
    %cst_8 = arith.constant 9.99999974E-5 : f32
    %cst_9 = arith.constant 1.000000e+00 : f32
    %13 = vector.broadcast %cst_8 : f32 to vector<1x128xf32>
    %14 = arith.maximumf %13, %12 : vector<1x128xf32>
    %15 = vector.broadcast %cst_9 : f32 to vector<1x128xf32>
    %16 = arith.minimumf %15, %14 : vector<1x128xf32>
    %c0_10 = arith.constant 0 : index
    %c0_11 = arith.constant 0 : index
    %17 = vector.load %arg5[%c0_10, %c0_11] : memref<1x128xf32, #tpu.memory_space<vmem>>, vector<1x128xf32>
    tpu.vector_store %arg5[%c0_10, %c0_11], %16 {strides = array<i32>} : memref<1x128xf32, #tpu.memory_space<vmem>>, vector<1x128xf32>,
    return
  }
  func.func @transform_0(%arg0: i32) -> (i32, i32) {
    %c0_i32 = arith.constant 0 : i32
    %c0_i32_0 = arith.constant 0 : i32
    return %arg0, %c0_i32 : i32, i32
  }
  func.func @transform_1(%arg0: i32) -> (i32, i32) {
    %c0_i32 = arith.constant 0 : i32
    %c0_i32_0 = arith.constant 0 : i32
    %c0_i32_1 = arith.constant 0 : i32
    return %c0_i32, %c0_i32_0 : i32, i32
  }
  func.func @transform_2(%arg0: i32) -> (i32, i32) {
    %c0_i32 = arith.constant 0 : i32
    %c0_i32_0 = arith.constant 0 : i32
    %c0_i32_1 = arith.constant 0 : i32
    return %c0_i32, %c0_i32_0 : i32, i32
  }
  func.func @transform_3(%arg0: i32) -> (i32, i32) {
    %c0_i32 = arith.constant 0 : i32
    %c0_i32_0 = arith.constant 0 : i32
    return %arg0, %c0_i32 : i32, i32
  }
  func.func @transform_4(%arg0: i32) -> (i32, i32) {
    %c0_i32 = arith.constant 0 : i32
    %c0_i32_0 = arith.constant 0 : i32
    return %arg0, %c0_i32 : i32, i32
  }
}

</mosaic_0001>

<bundles_post_ra>
// kernel: gaussian_policy_head.1
= control target key start
LH: loop header
LB: loop body
LE: loop exit
PB: predicated region body
PF: predicated region fallthrough
CT: control target
= control target key end

     0   :  { %s778_s1 = inlined_call_operand.vmem [shape: f32[512,256], index: 1, kind: input, shape index: {}]   ;;  %s779_s0 = inlined_call_operand.vmem [shape: f32[1,512], index: 0, kind: input, shape index: {}]   ;;  %s780_s2 = inlined_call_operand.vmem [shape: f32[1,256], index: 2, kind: input, shape index: {}]   ;;  %s781_s3 = inlined_call_operand.vmem [shape: f32[1,128], index: 3, kind: output, shape index: {0}]   ;;  %s782_s4 = inlined_call_operand.vmem [shape: f32[1,128], index: 4, kind: output, shape index: {1}]  }
   0x1   :  { %v111_v0 = vld [vmem:[%s778_s1 + $0x2f0] sm:$0xff]  ;;  %v109_v2 = vld [vmem:[%s778_s1 + $0x2e0] sm:$0xff]  ;;  %v112_v62 = vld [vmem:[%s778_s1 + $0x2f8] sm:$0xff] }
   0x2   :  { %v47_v1 = vld [vmem:[%s778_s1 + $0xf0] sm:$0xff]  ;;  %200 = vmatpush.msra.mxu2 %v111_v0  ;;  %v45_v4 = vld [vmem:[%s778_s1 + $0xe0] sm:$0xff]  ;;  %v48_v0 = vld [vmem:[%s778_s1 + $0xf8] sm:$0xff] }
   0x3   :  { %160 = vmatpush.msra.mxu0 %v47_v1  ;;  %v143_v3 = vld [vmem:[%s778_s1 + $0x3f0] sm:$0xff]  ;;  %v141_v7 = vld [vmem:[%s778_s1 + $0x3e0] sm:$0xff]  ;;  %v144_v1 = vld [vmem:[%s778_s1 + $0x3f8] sm:$0xff] }
   0x4   :  { %v79_v5 = vld [vmem:[%s778_s1 + $0x1f0] sm:$0xff]  ;;  %220 = vmatpush.msra.mxu3 %v143_v3  ;;  %201 = vmatpush.msra.mxu2 %v109_v2  ;;  %v77_v9 = vld [vmem:[%s778_s1 + $0x1e0] sm:$0xff]  ;;  %v110_v2 = vld [vmem:[%s778_s1 + $0x2e8] sm:$0xff] }
   0x5   :  { %180 = vmatpush.msra.mxu1 %v79_v5  ;;  %v107_v6 = vld [vmem:[%s778_s1 + $0x2d0] sm:$0xff]  ;;  %161 = vmatpush.msra.mxu0 %v45_v4  ;;  %v105_v11 = vld [vmem:[%s778_s1 + $0x2c0] sm:$0xff]  ;;  %v46_v4 = vld [vmem:[%s778_s1 + $0xe8] sm:$0xff] }
   0x6   :  { %v43_v8 = vld [vmem:[%s778_s1 + $0xd0] sm:$0xff]  ;;  %221 = vmatpush.msra.mxu3 %v141_v7  ;;  %v41_v12 = vld [vmem:[%s778_s1 + $0xc0] sm:$0xff]  ;;  %202 = vmatpush.msra.mxu2 %v107_v6  ;;  %v80_v5 = vld [vmem:[%s778_s1 + $0x1f8] sm:$0xff] }
   0x7   :  { %v139_v10 = vld [vmem:[%s778_s1 + $0x3d0] sm:$0xff]  ;;  %181 = vmatpush.msra.mxu1 %v77_v9  ;;  %162 = vmatpush.msra.mxu0 %v43_v8  ;;  %v137_v14 = vld [vmem:[%s778_s1 + $0x3c0] sm:$0xff]  ;;  %v108_v6 = vld [vmem:[%s778_s1 + $0x2d8] sm:$0xff] }
   0x8   :  { %v75_v13 = vld [vmem:[%s778_s1 + $0x1d0] sm:$0xff]  ;;  %v73_v15 = vld [vmem:[%s778_s1 + $0x1c0] sm:$0xff]  ;;  %222 = vmatpush.msra.mxu3 %v139_v10  ;;  %203 = vmatpush.msra.mxu2 %v105_v11  ;;  %v142_v7 = vld [vmem:[%s778_s1 + $0x3e8] sm:$0xff] }
   0x9   :  { %182 = vmatpush.msra.mxu1 %v75_v13  ;;  %v103_v16 = vld [vmem:[%s778_s1 + $0x2b0] sm:$0xff]  ;;  %163 = vmatpush.msra.mxu0 %v41_v12  ;;  %v101_v20 = vld [vmem:[%s778_s1 + $0x2a0] sm:$0xff]  ;;  %v44_v8 = vld [vmem:[%s778_s1 + $0xd8] sm:$0xff] }
   0xa   :  { %v39_v17 = vld [vmem:[%s778_s1 + $0xb0] sm:$0xff]  ;;  %223 = vmatpush.msra.mxu3 %v137_v14  ;;  %v37_v21 = vld [vmem:[%s778_s1 + $0xa0] sm:$0xff]  ;;  %204 = vmatpush.msra.mxu2 %v103_v16  ;;  %v78_v9 = vld [vmem:[%s778_s1 + $0x1e8] sm:$0xff] }
   0xb   :  { %v135_v18 = vld [vmem:[%s778_s1 + $0x3b0] sm:$0xff]  ;;  %183 = vmatpush.msra.mxu1 %v73_v15  ;;  %164 = vmatpush.msra.mxu0 %v39_v17  ;;  %v133_v22 = vld [vmem:[%s778_s1 + $0x3a0] sm:$0xff]  ;;  %v106_v10 = vld [vmem:[%s778_s1 + $0x2c8] sm:$0xff] }
   0xc   :  { %v71_v19 = vld [vmem:[%s778_s1 + $0x1b0] sm:$0xff]  ;;  %v69_v23 = vld [vmem:[%s778_s1 + $0x1a0] sm:$0xff]  ;;  %224 = vmatpush.msra.mxu3 %v135_v18  ;;  %205 = vmatpush.msra.mxu2 %v101_v20  ;;  %v140_v11 = vld [vmem:[%s778_s1 + $0x3d8] sm:$0xff] }
   0xd   :  { %184 = vmatpush.msra.mxu1 %v71_v19  ;;  %v99_v24 = vld [vmem:[%s778_s1 + $0x290] sm:$0xff]  ;;  %165 = vmatpush.msra.mxu0 %v37_v21  ;;  %v97_v28 = vld [vmem:[%s778_s1 + $0x280] sm:$0xff]  ;;  %v42_v12 = vld [vmem:[%s778_s1 + $0xc8] sm:$0xff] }
   0xe   :  { %v35_v25 = vld [vmem:[%s778_s1 + $0x90] sm:$0xff]  ;;  %225 = vmatpush.msra.mxu3 %v133_v22  ;;  %v33_v29 = vld [vmem:[%s778_s1 + $0x80] sm:$0xff]  ;;  %206 = vmatpush.msra.mxu2 %v99_v24  ;;  %v76_v13 = vld [vmem:[%s778_s1 + $0x1d8] sm:$0xff] }
   0xf   :  { %v131_v26 = vld [vmem:[%s778_s1 + $0x390] sm:$0xff]  ;;  %185 = vmatpush.msra.mxu1 %v69_v23  ;;  %166 = vmatpush.msra.mxu0 %v35_v25  ;;  %v129_v30 = vld [vmem:[%s778_s1 + $0x380] sm:$0xff]  ;;  %v104_v14 = vld [vmem:[%s778_s1 + $0x2b8] sm:$0xff] }
  0x10   :  { %v67_v27 = vld [vmem:[%s778_s1 + $0x190] sm:$0xff]  ;;  %v65_v31 = vld [vmem:[%s778_s1 + $0x180] sm:$0xff]  ;;  %226 = vmatpush.msra.mxu3 %v131_v26  ;;  %207 = vmatpush.msra.mxu2 %v97_v28  ;;  %v138_v15 = vld [vmem:[%s778_s1 + $0x3c8] sm:$0xff] }
  0x11   :  { %186 = vmatpush.msra.mxu1 %v67_v27  ;;  %v95_v32 = vld [vmem:[%s778_s1 + $0x270] sm:$0xff]  ;;  %167 = vmatpush.msra.mxu0 %v33_v29  ;;  %v93_v36 = vld [vmem:[%s778_s1 + $0x260] sm:$0xff]  ;;  %v40_v16 = vld [vmem:[%s778_s1 + $0xb8] sm:$0xff] }
  0x12   :  { %v31_v33 = vld [vmem:[%s778_s1 + $0x70] sm:$0xff]  ;;  %227 = vmatpush.msra.mxu3 %v129_v30  ;;  %v29_v37 = vld [vmem:[%s778_s1 + $0x60] sm:$0xff]  ;;  %208 = vmatpush.msra.mxu2 %v95_v32  ;;  %v74_v17 = vld [vmem:[%s778_s1 + $0x1c8] sm:$0xff] }
  0x13   :  { %v127_v34 = vld [vmem:[%s778_s1 + $0x370] sm:$0xff]  ;;  %187 = vmatpush.msra.mxu1 %v65_v31  ;;  %168 = vmatpush.msra.mxu0 %v31_v33  ;;  %v125_v38 = vld [vmem:[%s778_s1 + $0x360] sm:$0xff]  ;;  %v102_v18 = vld [vmem:[%s778_s1 + $0x2a8] sm:$0xff] }
  0x14   :  { %v63_v35 = vld [vmem:[%s778_s1 + $0x170] sm:$0xff]  ;;  %v61_v39 = vld [vmem:[%s778_s1 + $0x160] sm:$0xff]  ;;  %228 = vmatpush.msra.mxu3 %v127_v34  ;;  %209 = vmatpush.msra.mxu2 %v93_v36  ;;  %v136_v19 = vld [vmem:[%s778_s1 + $0x3b8] sm:$0xff] }
  0x15   :  { %188 = vmatpush.msra.mxu1 %v63_v35  ;;  %v91_v40 = vld [vmem:[%s778_s1 + $0x250] sm:$0xff]  ;;  %169 = vmatpush.msra.mxu0 %v29_v37  ;;  %v89_v44 = vld [vmem:[%s778_s1 + $0x240] sm:$0xff]  ;;  %v38_v20 = vld [vmem:[%s778_s1 + $0xa8] sm:$0xff] }
  0x16   :  { %v27_v41 = vld [vmem:[%s778_s1 + $0x50] sm:$0xff]  ;;  %229 = vmatpush.msra.mxu3 %v125_v38  ;;  %v25_v45 = vld [vmem:[%s778_s1 + $0x40] sm:$0xff]  ;;  %210 = vmatpush.msra.mxu2 %v91_v40  ;;  %v72_v21 = vld [vmem:[%s778_s1 + $0x1b8] sm:$0xff] }
  0x17   :  { %v123_v42 = vld [vmem:[%s778_s1 + $0x350] sm:$0xff]  ;;  %189 = vmatpush.msra.mxu1 %v61_v39  ;;  %170 = vmatpush.msra.mxu0 %v27_v41  ;;  %v121_v46 = vld [vmem:[%s778_s1 + $0x340] sm:$0xff]  ;;  %v100_v22 = vld [vmem:[%s778_s1 + $0x298] sm:$0xff] }
  0x18   :  { %v59_v43 = vld [vmem:[%s778_s1 + $0x150] sm:$0xff]  ;;  %v57_v47 = vld [vmem:[%s778_s1 + $0x140] sm:$0xff]  ;;  %230 = vmatpush.msra.mxu3 %v123_v42  ;;  %211 = vmatpush.msra.mxu2 %v89_v44  ;;  %v134_v23 = vld [vmem:[%s778_s1 + $0x3a8] sm:$0xff] }
  0x19   :  { %190 = vmatpush.msra.mxu1 %v59_v43  ;;  %v87_v48 = vld [vmem:[%s778_s1 + $0x230] sm:$0xff]  ;;  %171 = vmatpush.msra.mxu0 %v25_v45  ;;  %v85_v52 = vld [vmem:[%s778_s1 + $0x220] sm:$0xff]  ;;  %v36_v24 = vld [vmem:[%s778_s1 + $0x98] sm:$0xff] }
  0x1a   :  { %v23_v49 = vld [vmem:[%s778_s1 + $0x30] sm:$0xff]  ;;  %231 = vmatpush.msra.mxu3 %v121_v46  ;;  %v21_v53 = vld [vmem:[%s778_s1 + $0x20] sm:$0xff]  ;;  %212 = vmatpush.msra.mxu2 %v87_v48  ;;  %v70_v25 = vld [vmem:[%s778_s1 + $0x1a8] sm:$0xff] }
  0x1b   :  { %v119_v50 = vld [vmem:[%s778_s1 + $0x330] sm:$0xff]  ;;  %191 = vmatpush.msra.mxu1 %v57_v47  ;;  %172 = vmatpush.msra.mxu0 %v23_v49  ;;  %v117_v54 = vld [vmem:[%s778_s1 + $0x320] sm:$0xff]  ;;  %v98_v26 = vld [vmem:[%s778_s1 + $0x288] sm:$0xff] }
  0x1c   :  { %v55_v51 = vld [vmem:[%s778_s1 + $0x130] sm:$0xff]  ;;  %v53_v55 = vld [vmem:[%s778_s1 + $0x120] sm:$0xff]  ;;  %232 = vmatpush.msra.mxu3 %v119_v50  ;;  %213 = vmatpush.msra.mxu2 %v85_v52  ;;  %v132_v27 = vld [vmem:[%s778_s1 + $0x398] sm:$0xff] }
  0x1d   :  { %192 = vmatpush.msra.mxu1 %v55_v51  ;;  %v83_v56 = vld [vmem:[%s778_s1 + $0x210] sm:$0xff]  ;;  %173 = vmatpush.msra.mxu0 %v21_v53  ;;  %v81_v60 = vld [vmem:[%s778_s1 + $0x200] sm:$0xff]  ;;  %v34_v28 = vld [vmem:[%s778_s1 + $0x88] sm:$0xff] }
  0x1e   :  { %v19_v57 = vld [vmem:[%s778_s1 + $0x10] sm:$0xff]  ;;  %233 = vmatpush.msra.mxu3 %v117_v54  ;;  %v17_v61 = vld [vmem:[%s778_s1] sm:$0xff]  ;;  %214 = vmatpush.msra.mxu2 %v83_v56  ;;  %v68_v29 = vld [vmem:[%s778_s1 + $0x198] sm:$0xff] }
  0x1f   :  { %v115_v58 = vld [vmem:[%s778_s1 + $0x310] sm:$0xff]  ;;  %193 = vmatpush.msra.mxu1 %v53_v55  ;;  %174 = vmatpush.msra.mxu0 %v19_v57  ;;  %v113_v63 = vld [vmem:[%s778_s1 + $0x300] sm:$0xff]  ;;  %v96_v30 = vld [vmem:[%s778_s1 + $0x278] sm:$0xff] }
  0x20   :  { %v51_v59 = vld [vmem:[%s778_s1 + $0x110] sm:$0xff]  ;;  %234 = vmatpush.msra.mxu3 %v115_v58  ;;  %215 = vmatpush.msra.mxu2 %v81_v60  ;;  %v49_v3 = vld [vmem:[%s778_s1 + $0x100] sm:$0xff]  ;;  %v130_v31 = vld [vmem:[%s778_s1 + $0x388] sm:$0xff] }
  0x21   :  { %194 = vmatpush.msra.mxu1 %v51_v59  ;;  %175 = vmatpush.msra.mxu0 %v17_v61  ;;  %v32_v32 = vld [vmem:[%s778_s1 + $0x78] sm:$0xff]  ;;  %v66_v33 = vld [vmem:[%s778_s1 + $0x188] sm:$0xff]  ;;  %v685_v38 = vld [vmem:[%s779_s0] sm:$0xf] }
  0x22   :  { %280 = vmatpush.msrb.mxu2 %v112_v62  ;;  %235 = vmatpush.msra.mxu3 %v113_v63  ;;  %v94_v34 = vld [vmem:[%s778_s1 + $0x268] sm:$0xff]  ;;  %v128_v35 = vld [vmem:[%s778_s1 + $0x378] sm:$0xff]  ;;  %v149_v45 = vperm.slane %v685_v38, 2  ;;  %v147_v49 = vperm.slane %v685_v38, 0  ;;  %v150_v51 = vperm.slane %v685_v38, 3  ;;  %v148_v55 = vperm.slane %v685_v38, 1 }
  0x23   :  { %240 = vmatpush.msrb.mxu0 %v48_v0  ;;  %195 = vmatpush.msra.mxu1 %v49_v3  ;;  %v30_v36 = vld [vmem:[%s778_s1 + $0x68] sm:$0xff]  ;;  %v64_v37 = vld [vmem:[%s778_s1 + $0x178] sm:$0xff] }
  0x24   :  { %300 = vmatpush.msrb.mxu3 %v144_v1  ;;  %281 = vmatpush.msrb.mxu2 %v110_v2  ;;  %v92_v39 = vld [vmem:[%s778_s1 + $0x258] sm:$0xff]  ;;  %v126_v40 = vld [vmem:[%s778_s1 + $0x368] sm:$0xff] }
  0x25   :  { %241 = vmatpush.msrb.mxu0 %v46_v4  ;;  %260 = vmatpush.msrb.mxu1 %v80_v5  ;;  %v28_v41 = vld [vmem:[%s778_s1 + $0x58] sm:$0xff]  ;;  %v62_v42 = vld [vmem:[%s778_s1 + $0x168] sm:$0xff]  ;;  %v145_v5 = vld [vmem:[%s780_s2] sm:$0x3] }
  0x26   :  { %282 = vmatpush.msrb.mxu2 %v108_v6  ;;  %301 = vmatpush.msrb.mxu3 %v142_v7  ;;  %v90_v43 = vld [vmem:[%s778_s1 + $0x248] sm:$0xff]  ;;  %v124_v44 = vld [vmem:[%s778_s1 + $0x358] sm:$0xff]  ;;  %v156_v6 = vperm.slane %v145_v5, 0 }
  0x27   :  { %242 = vmatpush.msrb.mxu0 %v44_v8  ;;  %261 = vmatpush.msrb.mxu1 %v78_v9  ;;  %v26_v46 = vld [vmem:[%s778_s1 + $0x48] sm:$0xff]  ;;  %v60_v47 = vld [vmem:[%s778_s1 + $0x158] sm:$0xff] }
  0x28   :  { %283 = vmatpush.msrb.mxu2 %v106_v10  ;;  %302 = vmatpush.msrb.mxu3 %v140_v11  ;;  %v88_v48 = vld [vmem:[%s778_s1 + $0x238] sm:$0xff]  ;;  %v122_v50 = vld [vmem:[%s778_s1 + $0x348] sm:$0xff] }
  0x29   :  { %243 = vmatpush.msrb.mxu0 %v42_v12  ;;  %262 = vmatpush.msrb.mxu1 %v76_v13  ;;  %v24_v52 = vld [vmem:[%s778_s1 + $0x38] sm:$0xff]  ;;  %v58_v53 = vld [vmem:[%s778_s1 + $0x148] sm:$0xff] }
  0x2a   :  { %284 = vmatpush.msrb.mxu2 %v104_v14  ;;  %303 = vmatpush.msrb.mxu3 %v138_v15  ;;  %v86_v54 = vld [vmem:[%s778_s1 + $0x228] sm:$0xff]  ;;  %v120_v56 = vld [vmem:[%s778_s1 + $0x338] sm:$0xff]  ;;  %v157_v14 = vperm.slane %v145_v5, 1 }
  0x2b   :  { %244 = vmatpush.msrb.mxu0 %v40_v16  ;;  %263 = vmatpush.msrb.mxu1 %v74_v17  ;;  %v22_v57 = vld [vmem:[%s778_s1 + $0x28] sm:$0xff]  ;;  %v56_v58 = vld [vmem:[%s778_s1 + $0x138] sm:$0xff] }
  0x2c   :  { %285 = vmatpush.msrb.mxu2 %v102_v18  ;;  %304 = vmatpush.msrb.mxu3 %v136_v19  ;;  %v84_v59 = vld [vmem:[%s778_s1 + $0x218] sm:$0xff]  ;;  %v118_v60 = vld [vmem:[%s778_s1 + $0x328] sm:$0xff] }
  0x2d   :  { %245 = vmatpush.msrb.mxu0 %v38_v20  ;;  %264 = vmatpush.msrb.mxu1 %v72_v21  ;;  %v20_v61 = vld [vmem:[%s778_s1 + $0x18] sm:$0xff]  ;;  %v54_v62 = vld [vmem:[%s778_s1 + $0x128] sm:$0xff] }
  0x2e   :  { %286 = vmatpush.msrb.mxu2 %v100_v22  ;;  %305 = vmatpush.msrb.mxu3 %v134_v23  ;;  %v82_v63 = vld [vmem:[%s778_s1 + $0x208] sm:$0xff]  ;;  %v116_v0 = vld [vmem:[%s778_s1 + $0x318] sm:$0xff] }
  0x2f   :  { %246 = vmatpush.msrb.mxu0 %v36_v24  ;;  %265 = vmatpush.msrb.mxu1 %v70_v25  ;;  %v18_v1 = vld [vmem:[%s778_s1 + $0x8] sm:$0xff]  ;;  %v52_v2 = vld [vmem:[%s778_s1 + $0x118] sm:$0xff] }
  0x30   :  { %287 = vmatpush.msrb.mxu2 %v98_v26  ;;  %306 = vmatpush.msrb.mxu3 %v132_v27  ;;  %v114_v3 = vld [vmem:[%s778_s1 + $0x308] sm:$0xff] }
  0x31   :  { %247 = vmatpush.msrb.mxu0 %v34_v28  ;;  %266 = vmatpush.msrb.mxu1 %v68_v29  ;;  %v50_v4 = vld [vmem:[%s778_s1 + $0x108] sm:$0xff] }
  0x32   :  { %288 = vmatpush.msrb.mxu2 %v96_v30  ;;  %307 = vmatpush.msrb.mxu3 %v130_v31 }
  0x33   :  { %248 = vmatpush.msrb.mxu0 %v32_v32  ;;  %267 = vmatpush.msrb.mxu1 %v66_v33 }
  0x34   :  { %289 = vmatpush.msrb.mxu2 %v94_v34  ;;  %308 = vmatpush.msrb.mxu3 %v128_v35 }
  0x35   :  { %249 = vmatpush.msrb.mxu0 %v30_v36  ;;  %268 = vmatpush.msrb.mxu1 %v64_v37 }
  0x36   :  { %290 = vmatpush.msrb.mxu2 %v92_v39  ;;  %309 = vmatpush.msrb.mxu3 %v126_v40 }
  0x37   :  { %250 = vmatpush.msrb.mxu0 %v28_v41  ;;  %269 = vmatpush.msrb.mxu1 %v62_v42 }
  0x38   :  { %291 = vmatpush.msrb.mxu2 %v90_v43  ;;  %310 = vmatpush.msrb.mxu3 %v124_v44 }
  0x39   :  { %216 = vmatmul.f32.vlgmr.msra.gmra.mxu2 %v149_v45  ;;  %251 = vmatpush.msrb.mxu0 %v26_v46 }
  0x3a   :  { %270 = vmatpush.msrb.mxu1 %v60_v47  ;;  %292 = vmatpush.msrb.mxu2 %v88_v48 }
  0x3b   :  { %311 = vmatpush.msrb.mxu3 %v122_v50  ;;  %176 = vmatmul.f32.vlgmr.msra.gmra.mxu0 %v147_v49 }
  0x3c   :  { %236 = vmatmul.f32.vlgmr.msra.gmra.mxu3 %v150_v51  ;;  %252 = vmatpush.msrb.mxu0 %v24_v52 }
  0x3d   :  { %271 = vmatpush.msrb.mxu1 %v58_v53  ;;  %293 = vmatpush.msrb.mxu2 %v86_v54 }
  0x3e   :  { %312 = vmatpush.msrb.mxu3 %v120_v56  ;;  %196 = vmatmul.f32.vlgmr.msra.gmra.mxu1 %v148_v55 }
  0x3f   :  { %253 = vmatpush.msrb.mxu0 %v22_v57  ;;  %272 = vmatpush.msrb.mxu1 %v56_v58 }
  0x40   :  { %294 = vmatpush.msrb.mxu2 %v84_v59  ;;  %313 = vmatpush.msrb.mxu3 %v118_v60 }
  0x41   :  { %254 = vmatpush.msrb.mxu0 %v20_v61  ;;  %273 = vmatpush.msrb.mxu1 %v54_v62 }
  0x42   :  { %295 = vmatpush.msrb.mxu2 %v82_v63  ;;  %314 = vmatpush.msrb.mxu3 %v116_v0 }
  0x43   :  { %296 = vmatmul.f32.vlgmr.msrb.gmra.mxu2 %v149_v45  ;;  %255 = vmatpush.msrb.mxu0 %v18_v1 }
  0x44   :  { %274 = vmatpush.msrb.mxu1 %v52_v2  ;;  %315 = vmatpush.msrb.mxu3 %v114_v3 }
  0x45   :  { %256 = vmatmul.f32.vlgmr.msrb.gmra.mxu0 %v147_v49  ;;  %316 = vmatmul.f32.vlgmr.msrb.gmra.mxu3 %v150_v51 }
  0x46   :  { %275 = vmatpush.msrb.mxu1 %v50_v4 }
  0x47   :  { %276 = vmatmul.f32.vlgmr.msrb.gmra.mxu1 %v148_v55 }
  0xb8   :  { %v177_v7 = vpop.f32.mrf.mxu0 }
  0xb9   :  { %v178_v8 = vadd.f32 %v177_v7, %v156_v6 }
  0xbb   :  { %v197_v9 = vpop.f32.mrf.mxu1 }
  0xbc   :  { %v198_v10 = vadd.f32 %v197_v9, %v178_v8  ;;  %v217_v11 = vpop.f32.mrf.mxu2 }
  0xbe   :  { %v218_v12 = vadd.f32 %v217_v11, %v198_v10 }
  0xbf   :  { %v237_v13 = vpop.f32.mrf.mxu3 }
  0xc0   :  { %v238_v15 = vadd.f32 %v237_v13, %v218_v12 }
  0xc2   :  { %345 = vtanh.f32 %v238_v15  ;;  %v257_v16 = vpop.f32.mrf.mxu0 }
  0xc3   :  { %v258_v17 = vadd.f32 %v257_v16, %v157_v14 }
  0xc4   :  { %v277_v18 = vpop.f32.mrf.mxu1 }
  0xc5   :  { %v278_v19 = vadd.f32 %v277_v18, %v258_v17 }
  0xc6   :  { %v297_v20 = vpop.f32.mrf.mxu2 }
  0xc7   :  { %v298_v21 = vadd.f32 %v297_v20, %v278_v19 }
  0xc8   :  { %v346_v22 = vpop.eup %345  ;;  %v317_v23 = vpop.f32.mrf.mxu3 }
  0xc9   :  { %321 = vst [vmem:[%s781_s3] sm:$0x1] %v346_v22  ;;  %v318_v24 = vadd.f32 %v317_v23, %v298_v21 }
  0xcb   :  { %v322_v25 = vmin.f32 %v318_v24, 20.0 }
  0xcd   :  { %v323_v26 = vmul.f32 1.442695, %v322_v25 }
  0xcf   :  { %347 = vpow2.f32 %v323_v26 }
  0xd5   :  { %v348_v27 = vpop.eup %347 }
  0xd6   :  { %v325_v28 = vadd.f32 1.0, %v348_v27  ;;  %v328_v29 = vmul.f32 -0.5, %v348_v27  ;;  %v331_v31 = vand.u32 2147483647, %v348_v27 }
  0xd8   :  { %349 = vlog2.f32 %v325_v28  ;;  %v329_v30 = vadd.f32 1.0, %v328_v29  ;;  %vm332_vm0 = vcmp.lt.f32.partialorder %v331_v31, 0.0004427343 }
  0xda   :  { %v330_v34 = vmul.f32 %v348_v27, %v329_v30 }
  0xde   :  { %v350_v32 = vpop.eup %349 }
  0xdf   :  { %v327_v33 = vmul.f32 0.6931472, %v350_v32 }
  0xe1   :  { %v333_v35 = vsel %vm332_vm0, %v330_v34, %v327_v33 }
  0xe2   :  { %v334_v36 = vmax.f32 %v333_v35, 0.0001 }
  0xe4   :  { %v335_v37 = vmin.f32 %v334_v36, 1.0 }
  0xe6   :  { %336 = vst [vmem:[%s782_s4] sm:$0x1] %v335_v37 }

</bundles_post_ra>
